<compile_context>
chip_gen: v5e
topology: v5e:2x2
jax: 0.10.0
libtpu: 0.0.40
codegen_flags: <defaults>
</compile_context>

<pallas_src>
import functools

import jax
import jax.numpy as jnp
from jax.experimental import pallas as pl
from jax.experimental.pallas import tpu as pltpu


def _round_up(x, m):
    return ((x + m - 1) // m) * m


def _cdiv(a, b):
    return (a + b - 1) // b


# ----------------------------- Pallas kernel --------------------------------

def _affine_apply_kernel(coef_ref, xyz_ref, out_ref):
    # coef_ref: (b_tile, 12) f32 VMEM.
    #           per batch b: [R00..R22 (row-major), ts*t0, ts*t1, ts*t2]
    # xyz_ref:  (3, b_tile, n_pad) coords-major SoA points (batch in sublanes, points in lanes).
    # out_ref:  (3, b_tile, n_pad)
    x0 = xyz_ref[0].astype(jnp.float32)          # (b_tile, n_pad) -- full dense vregs
    x1 = xyz_ref[1].astype(jnp.float32)
    x2 = xyz_ref[2].astype(jnp.float32)
    coef = coef_ref[...]                         # (b_tile, 12)
    for j in range(3):
        # out[j] = R[0,j]*x0 + R[1,j]*x1 + R[2,j]*x2 + trans_scale*t[j]
        r = (coef[:, j:j + 1] * x0
             + coef[:, j + 3:j + 4] * x1
             + coef[:, j + 6:j + 7] * x2
             + coef[:, j + 9:j + 10])
        out_ref[j] = r.astype(out_ref.dtype)     # direct plane store, no concatenate


def affine_apply_soa(xyz_s, coef, *, b_tile):
    """xyz_s: (3, bs_pad, n_pad); coef: (bs_pad, 12) f32 -> (3, bs_pad, n_pad).

    Note: padded point lanes (>= n) receive the translation bias and padded batch rows are
    zero (their coefficients are zero); callers must slice the result and never reduce over it.
    """
    _, bs_pad, n_pad = xyz_s.shape
    num_blocks = bs_pad // b_tile
    itemsize = jnp.dtype(xyz_s.dtype).itemsize

    # Honest VMEM accounting: double-buffered input + output point blocks plus the
    # (lane-padded to 128) coefficient block, with headroom; never below the 32 MiB default.
    block_bytes = 3 * b_tile * n_pad * itemsize
    coef_block_bytes = b_tile * 128 * 4
    vmem_limit = 2 * (2 * block_bytes + coef_block_bytes) + (8 << 20)
    vmem_limit = int(max(vmem_limit, 32 << 20))

    return pl.pallas_call(
        _affine_apply_kernel,
        out_shape=jax.ShapeDtypeStruct((3, bs_pad, n_pad), xyz_s.dtype),
        grid_spec=pltpu.PrefetchScalarGridSpec(
            num_scalar_prefetch=0,
            grid=(num_blocks,),
            in_specs=[
                # Per-block coefficient tile in VMEM (lane-broadcast inside the kernel).
                pl.BlockSpec((b_tile, 12), lambda t: (t, 0)),
                # Dense (3, b_tile, n_pad) point blocks: sublanes = batch, lanes = points.
                pl.BlockSpec((3, b_tile, n_pad), lambda t: (0, t, 0)),
            ],
            out_specs=pl.BlockSpec((3, b_tile, n_pad), lambda t: (0, t, 0)),
        ),
        compiler_params=pltpu.CompilerParams(
            dimension_semantics=("parallel",),
            vmem_limit_bytes=vmem_limit,
        ),
    )(coef, xyz_s)


# ------------------------ generation-aware tiling ----------------------------

def _tpu_vmem_bytes():
    try:
        return int(pltpu.get_tpu_info().vmem_capacity_bytes)
    except Exception:
        return 64 << 20   # conservative (v7x per-TC size)


def _num_tensorcores():
    try:
        info = pltpu.get_tpu_info()
    except Exception:
        return 1
    for attr in ("num_cores", "core_count", "num_tensorcores",
                 "tensor_cores_per_chip", "cores_per_chip"):
        v = getattr(info, attr, None)
        if isinstance(v, int) and v > 0:
            return v
    return 1   # v5e / v6e: single TensorCore per chip


def _choose_tiling(bs, n_pad, itemsize):
    """Pick (b_tile, bs_pad): b_tile multiple of 8, blocks ~VMEM/16 bytes, even grid on multi-TC."""
    bs_pad8 = _round_up(max(bs, 1), 8)
    vmem = _tpu_vmem_bytes()
    ncores = _num_tensorcores()

    target_block_bytes = max(1 << 20, vmem // 16)       # ~4 MiB v7x, ~8 MiB v5e/v6e
    per_batch = 3 * n_pad * itemsize
    b_cap = max(8, (target_block_bytes // per_batch) // 8 * 8)

    num_blocks = max(1, _cdiv(bs_pad8, b_cap))
    if ncores > 1:
        # Keep both TensorCores busy with an even grid, but only if each core gets a
        # reasonable amount of work; single-TC chips prefer one big block (less per-step overhead).
        if num_blocks == 1 and bs_pad8 >= 16:
            num_blocks = ncores
        num_blocks = _round_up(num_blocks, ncores)

    b_tile = _round_up(_cdiv(bs_pad8, num_blocks), 8)
    bs_pad = b_tile * num_blocks
    return int(b_tile), int(bs_pad)


# ------------------------------ JAX glue -------------------------------------

def cross_matrix(k):
    z = jnp.zeros(k.shape[:-1], k.dtype)
    r0 = jnp.stack([z, -k[..., 2], k[..., 1]], -1)
    r1 = jnp.stack([k[..., 2], z, -k[..., 0]], -1)
    r2 = jnp.stack([-k[..., 1], k[..., 0], z], -1)
    return jnp.stack([r0, r1, r2], -2)


def shear_matrix(k):
    z = jnp.zeros(k.shape[:-1], k.dtype)
    r0 = jnp.stack([z, k[..., 2], k[..., 1]], -1)
    r1 = jnp.stack([k[..., 2], z, k[..., 0]], -1)
    r2 = jnp.stack([k[..., 1], k[..., 0], z], -1)
    return jnp.stack([r0, r1, r2], -2)


def squeeze_matrix(k):
    z = jnp.zeros(k.shape[:-1], k.dtype)
    d0 = k[..., 0] + k[..., 2]
    d1 = -k[..., 0] + k[..., 1] + k[..., 2]
    d2 = -k[..., 1] + k[..., 2]
    r0 = jnp.stack([d0, z, z], -1)
    r1 = jnp.stack([z, d1, z], -1)
    r2 = jnp.stack([z, z, d2], -1)
    return jnp.stack([r0, r1, r2], -2)


def expm_taylor(a, order=16, scale_pow=8):
    """Scaling-and-squaring Taylor matrix exponential on (..., n, n) (matches augerino expm)."""
    a = a / (2.0 ** scale_pow)
    n = a.shape[-1]
    eye = jnp.broadcast_to(jnp.eye(n, dtype=a.dtype), a.shape)
    result = eye
    term = eye
    for i in range(1, order + 1):
        term = jnp.matmul(term, a) / i
        result = result + term
    for _ in range(scale_pow):
        result = jnp.matmul(result, result)
    return result


def _affine_matrices(z):
    """z: (bs, 12) -> expm of the 4x4 affine generators, shape (bs, 4, 4)."""
    bs = z.shape[0]
    g3 = cross_matrix(z[:, :3]) + shear_matrix(z[:, 3:6]) + squeeze_matrix(z[:, 6:9])
    gen = jnp.zeros((bs, 4, 4), z.dtype)
    gen = gen.at[:, :3, :3].set(g3)
    gen = gen.at[:, :3, 3].set(z[:, 9:])
    return expm_taylor(gen)


def affine_uniform_3d_forward(inp, width, key, trans_scale=0.5):
    """Forward pass of AffineUniform3d.  inp = (xyz, vals, mask).  Run under jit."""
    xyz, vals, mask = inp
    bs, n, _ = xyz.shape
    # TODO(synk): torch.rand is stateful global RNG; here randomness comes from an explicit key.
    z = jax.random.uniform(key, (bs, 12), dtype=xyz.dtype) * jax.nn.softplus(width)
    aff = _affine_matrices(z)                               # (bs, 4, 4)
    rot = aff[:, :3, :3]                                    # (bs, 3, 3)
    trans = aff[:, :3, 3] * trans_scale                     # trans_scale folded here

    # Coords-major SoA layout: (bs, N, 3) -> (3, bs_pad, n_pad); batch -> sublanes (x8),
    # points -> lanes (x128), so every kernel vreg is dense.
    n_pad = _round_up(max(n, 1), 128)
    itemsize = jnp.dtype(xyz.dtype).itemsize
    b_tile, bs_pad = _choose_tiling(bs, n_pad, itemsize)

    xyz_s = jnp.transpose(xyz, (2, 0, 1))                   # (3, bs, n)
    xyz_s = jnp.pad(xyz_s, ((0, 0), (0, bs_pad - bs), (0, n_pad - n)))

    coef = jnp.concatenate([rot.reshape(bs, 9), trans], axis=1).astype(jnp.float32)  # (bs, 12)
    coef = jnp.pad(coef, ((0, bs_pad - bs), (0, 0)))                                  # (bs_pad, 12)

    out_s = affine_apply_soa(xyz_s, coef, b_tile=b_tile)    # (3, bs_pad, n_pad)
    # TODO(synk): if downstream consumers accept the coords-major layout, skip this back-transpose.
    transformed_xyz = jnp.transpose(out_s, (1, 2, 0))[:bs, :n, :]
    return transformed_xyz, vals, mask


# -------------------------------- main ---------------------------------------

if __name__ == "__main__":
    key = jax.random.PRNGKey(0)
    k_xyz, k_vals, k_z = jax.random.split(key, 3)

    bs, n = 2, 8
    xyz = jax.random.normal(k_xyz, (bs, n, 3), dtype=jnp.float32)
    vals = jax.random.normal(k_vals, (bs, n, 6), dtype=jnp.float32)
    mask = jnp.ones((bs, n), dtype=jnp.bool_)

    # Deterministic parameter init, matching nn.Parameter(0.54 * torch.ones(12)).
    width = 0.54 * jnp.ones((12,), dtype=jnp.float32)
    trans_scale = 0.5

    fwd = jax.jit(affine_uniform_3d_forward, static_argnames=("trans_scale",))
    out_xyz, out_vals, out_mask = fwd((xyz, vals, mask), width, k_z, trans_scale=trans_scale)
    jax.block_until_ready(out_xyz)

    # Pure-JAX reference for the Pallas hot path (same z / same affine matrices).
    z_ref = jax.random.uniform(k_z, (bs, 12), dtype=xyz.dtype) * jax.nn.softplus(width)
    aff_ref = _affine_matrices(z_ref)
    ref = (jnp.einsum("bnk,bkj->bnj", xyz, aff_ref[:, :3, :3])
           + aff_ref[:, None, :3, 3] * trans_scale)

    assert out_xyz.shape == (bs, n, 3)
    assert out_vals.shape == vals.shape and out_mask.shape == mask.shape
    assert jnp.allclose(out_xyz, ref, rtol=1e-5, atol=1e-5)

    print("KERNEL_OK")
</pallas_src>

<mosaic_0001>
module attributes {stable_mosaic.version = 11 : i64} {
  func.func @_affine_apply_kernel(%arg0: i32, %arg1: memref<8x12xf32, #tpu.memory_space<vmem>>, %arg2: memref<3x8x128xf32, #tpu.memory_space<vmem>>, %arg3: memref<3x8x128xf32, #tpu.memory_space<vmem>>) attributes {dimension_semantics = [#tpu.dimension_semantics<parallel>], iteration_bounds = array<i64: 1>, scalar_prefetch = 0 : i64, scratch_operands = 0 : i64, tpu.core_type = #tpu.core_type<tc>, window_params = [{transform_indices = @transform_0, window_bounds = array<i64: 8, 12>}, {transform_indices = @transform_1, window_bounds = array<i64: 3, 8, 128>}, {transform_indices = @transform_2, window_bounds = array<i64: 3, 8, 128>}]} {
    %c0 = arith.constant 0 : index
    %c0_0 = arith.constant 0 : index
    %c0_1 = arith.constant 0 : index
    %0 = vector.load %arg2[%c0, %c0_0, %c0_1] : memref<3x8x128xf32, #tpu.memory_space<vmem>>, vector<1x8x128xf32>
    %1 = vector.shape_cast %0 : vector<1x8x128xf32> to vector<8x128xf32>
    %c1 = arith.constant 1 : index
    %c0_2 = arith.constant 0 : index
    %c0_3 = arith.constant 0 : index
    %2 = vector.load %arg2[%c1, %c0_2, %c0_3] : memref<3x8x128xf32, #tpu.memory_space<vmem>>, vector<1x8x128xf32>
    %3 = vector.shape_cast %2 : vector<1x8x128xf32> to vector<8x128xf32>
    %c2 = arith.constant 2 : index
    %c0_4 = arith.constant 0 : index
    %c0_5 = arith.constant 0 : index
    %4 = vector.load %arg2[%c2, %c0_4, %c0_5] : memref<3x8x128xf32, #tpu.memory_space<vmem>>, vector<1x8x128xf32>
    %5 = vector.shape_cast %4 : vector<1x8x128xf32> to vector<8x128xf32>
    %c0_6 = arith.constant 0 : index
    %c0_7 = arith.constant 0 : index
    %6 = vector.load %arg1[%c0_6, %c0_7] : memref<8x12xf32, #tpu.memory_space<vmem>>, vector<8x12xf32>
    %7 = vector.extract_strided_slice %6 {offsets = [0, 0], sizes = [8, 1], strides = [1, 1]} : vector<8x12xf32> to vector<8x1xf32>
    %8 = vector.broadcast %7 : vector<8x1xf32> to vector<8x128xf32>
    %9 = arith.mulf %8, %1 : vector<8x128xf32>
    %10 = vector.extract_strided_slice %6 {offsets = [0, 3], sizes = [8, 1], strides = [1, 1]} : vector<8x12xf32> to vector<8x1xf32>
    %11 = vector.broadcast %10 : vector<8x1xf32> to vector<8x128xf32>
    %12 = arith.mulf %11, %3 : vector<8x128xf32>
    %13 = arith.addf %9, %12 : vector<8x128xf32>
    %14 = vector.extract_strided_slice %6 {offsets = [0, 6], sizes = [8, 1], strides = [1, 1]} : vector<8x12xf32> to vector<8x1xf32>
    %15 = vector.broadcast %14 : vector<8x1xf32> to vector<8x128xf32>
    %16 = arith.mulf %15, %5 : vector<8x128xf32>
    %17 = arith.addf %13, %16 : vector<8x128xf32>
    %18 = vector.extract_strided_slice %6 {offsets = [0, 9], sizes = [8, 1], strides = [1, 1]} : vector<8x12xf32> to vector<8x1xf32>
    %19 = vector.broadcast %18 : vector<8x1xf32> to vector<8x128xf32>
    %20 = arith.addf %17, %19 : vector<8x128xf32>
    %c0_8 = arith.constant 0 : index
    %c0_9 = arith.constant 0 : index
    %c0_10 = arith.constant 0 : index
    %21 = vector.load %arg3[%c0_8, %c0_9, %c0_10] : memref<3x8x128xf32, #tpu.memory_space<vmem>>, vector<1x8x128xf32>
    %22 = vector.shape_cast %21 : vector<1x8x128xf32> to vector<8x128xf32>
    %23 = vector.shape_cast %20 : vector<8x128xf32> to vector<1x8x128xf32>
    tpu.vector_store %arg3[%c0_8, %c0_9, %c0_10], %23 {strides = array<i32>} : memref<3x8x128xf32, #tpu.memory_space<vmem>>, vector<1x8x128xf32>,
    %24 = vector.extract_strided_slice %6 {offsets = [0, 1], sizes = [8, 1], strides = [1, 1]} : vector<8x12xf32> to vector<8x1xf32>
    %25 = vector.broadcast %24 : vector<8x1xf32> to vector<8x128xf32>
    %26 = arith.mulf %25, %1 : vector<8x128xf32>
    %27 = vector.extract_strided_slice %6 {offsets = [0, 4], sizes = [8, 1], strides = [1, 1]} : vector<8x12xf32> to vector<8x1xf32>
    %28 = vector.broadcast %27 : vector<8x1xf32> to vector<8x128xf32>
    %29 = arith.mulf %28, %3 : vector<8x128xf32>
    %30 = arith.addf %26, %29 : vector<8x128xf32>
    %31 = vector.extract_strided_slice %6 {offsets = [0, 7], sizes = [8, 1], strides = [1, 1]} : vector<8x12xf32> to vector<8x1xf32>
    %32 = vector.broadcast %31 : vector<8x1xf32> to vector<8x128xf32>
    %33 = arith.mulf %32, %5 : vector<8x128xf32>
    %34 = arith.addf %30, %33 : vector<8x128xf32>
    %35 = vector.extract_strided_slice %6 {offsets = [0, 10], sizes = [8, 1], strides = [1, 1]} : vector<8x12xf32> to vector<8x1xf32>
    %36 = vector.broadcast %35 : vector<8x1xf32> to vector<8x128xf32>
    %37 = arith.addf %34, %36 : vector<8x128xf32>
    %c1_11 = arith.constant 1 : index
    %c0_12 = arith.constant 0 : index
    %c0_13 = arith.constant 0 : index
    %38 = vector.load %arg3[%c1_11, %c0_12, %c0_13] : memref<3x8x128xf32, #tpu.memory_space<vmem>>, vector<1x8x128xf32>
    %39 = vector.shape_cast %38 : vector<1x8x128xf32> to vector<8x128xf32>
    %40 = vector.shape_cast %37 : vector<8x128xf32> to vector<1x8x128xf32>
    tpu.vector_store %arg3[%c1_11, %c0_12, %c0_13], %40 {strides = array<i32>} : memref<3x8x128xf32, #tpu.memory_space<vmem>>, vector<1x8x128xf32>,
    %41 = vector.extract_strided_slice %6 {offsets = [0, 2], sizes = [8, 1], strides = [1, 1]} : vector<8x12xf32> to vector<8x1xf32>
    %42 = vector.broadcast %41 : vector<8x1xf32> to vector<8x128xf32>
    %43 = arith.mulf %42, %1 : vector<8x128xf32>
    %44 = vector.extract_strided_slice %6 {offsets = [0, 5], sizes = [8, 1], strides = [1, 1]} : vector<8x12xf32> to vector<8x1xf32>
    %45 = vector.broadcast %44 : vector<8x1xf32> to vector<8x128xf32>
    %46 = arith.mulf %45, %3 : vector<8x128xf32>
    %47 = arith.addf %43, %46 : vector<8x128xf32>
    %48 = vector.extract_strided_slice %6 {offsets = [0, 8], sizes = [8, 1], strides = [1, 1]} : vector<8x12xf32> to vector<8x1xf32>
    %49 = vector.broadcast %48 : vector<8x1xf32> to vector<8x128xf32>
    %50 = arith.mulf %49, %5 : vector<8x128xf32>
    %51 = arith.addf %47, %50 : vector<8x128xf32>
    %52 = vector.extract_strided_slice %6 {offsets = [0, 11], sizes = [8, 1], strides = [1, 1]} : vector<8x12xf32> to vector<8x1xf32>
    %53 = vector.broadcast %52 : vector<8x1xf32> to vector<8x128xf32>
    %54 = arith.addf %51, %53 : vector<8x128xf32>
    %c2_14 = arith.constant 2 : index
    %c0_15 = arith.constant 0 : index
    %c0_16 = arith.constant 0 : index
    %55 = vector.load %arg3[%c2_14, %c0_15, %c0_16] : memref<3x8x128xf32, #tpu.memory_space<vmem>>, vector<1x8x128xf32>
    %56 = vector.shape_cast %55 : vector<1x8x128xf32> to vector<8x128xf32>
    %57 = vector.shape_cast %54 : vector<8x128xf32> to vector<1x8x128xf32>
    tpu.vector_store %arg3[%c2_14, %c0_15, %c0_16], %57 {strides = array<i32>} : memref<3x8x128xf32, #tpu.memory_space<vmem>>, vector<1x8x128xf32>,
    return
  }
  func.func @transform_0(%arg0: i32) -> (i32, i32) {
    %c0_i32 = arith.constant 0 : i32
    %c0_i32_0 = arith.constant 0 : i32
    return %arg0, %c0_i32 : i32, i32
  }
  func.func @transform_1(%arg0: i32) -> (i32, i32, i32) {
    %c0_i32 = arith.constant 0 : i32
    %c0_i32_0 = arith.constant 0 : i32
    %c0_i32_1 = arith.constant 0 : i32
    return %c0_i32, %arg0, %c0_i32_0 : i32, i32, i32
  }
  func.func @transform_2(%arg0: i32) -> (i32, i32, i32) {
    %c0_i32 = arith.constant 0 : i32
    %c0_i32_0 = arith.constant 0 : i32
    %c0_i32_1 = arith.constant 0 : i32
    return %c0_i32, %arg0, %c0_i32_0 : i32, i32, i32
  }
}

</mosaic_0001>

<bundles_post_ra>
// kernel: affine_uniform_3d_forward.1
= control target key start
LH: loop header
LB: loop body
LE: loop exit
PB: predicated region body
PF: predicated region fallthrough
CT: control target
= control target key end

     0   :  { %v122_v0 = vmov 6   ;;  %v123_v1 = vmov 0   ;;  %v124_v3 = vmov 1   ;;  %v125_v4 = vmov 9   ;;  %s170_s0 = inlined_call_operand.vmem [shape: f32[8,12], index: 0, kind: input, shape index: {}]   ;;  %s171_s1 = inlined_call_operand.vmem [shape: f32[3,8,128], index: 1, kind: input, shape index: {}]   ;;  %s172_s2 = inlined_call_operand.vmem [shape: f32[3,8,128], index: 2, kind: output, shape index: {}]  }
   0x1   :  { %111 = vset.pattern.permute.xlu1 %v122_v0  ;;  %109 = vset.pattern.permute.xlu0 %v123_v1  ;;  %v16_v2 = vld [vmem:[%s170_s0] sm:$0xff]  ;;  %v126_v5 = vmov 3   ;;  %v127_v6 = vmov 4   ;;  %v128_v7 = vmov 2   ;;  %v129_v8 = vmov 7   ;;  %v93_v18 = vld [vmem:[%s171_s1 + $0x8] sm:$0xff] }
   0x2   :  { %30 = vperm.xlu1 %111, %v16_v2   ;;  %19 = vperm.xlu0 %109, %v16_v2   ;;  %v130_v9 = vmov 5   ;;  %v131_v10 = vmov 8   ;;  %v132_v11 = vmov 11   ;;  %v133_v12 = vmov 10   ;;  %v11_v17 = vld [vmem:[%s171_s1] sm:$0xff]  ;;  %v94_v20 = vld [vmem:[%s171_s1 + $0x10] sm:$0xff] }
   0x3   :  { %113 = vset.pattern.permute.xlu2 %v124_v3 }
   0x4   :  { %42 = vperm.xlu2 %113, %v16_v2  }
   0xa   :  { %112 = vset.pattern.permute.xlu1 %v125_v4  ;;  %110 = vset.pattern.permute.xlu0 %v126_v5 }
   0xb   :  { %36 = vperm.xlu1 %112, %v16_v2   ;;  %24 = vperm.xlu0 %110, %v16_v2  }
   0xc   :  { %114 = vset.pattern.permute.xlu2 %v127_v6 }
   0xd   :  { %47 = vperm.xlu2 %114, %v16_v2  }
  0x13   :  { %115 = vset.pattern.permute.xlu1 %v128_v7  ;;  %117 = vset.pattern.permute.xlu0 %v129_v8 }
  0x14   :  { %66 = vperm.xlu1 %115, %v16_v2   ;;  %53 = vperm.xlu0 %117, %v16_v2  }
  0x15   :  { %116 = vset.pattern.permute.xlu2 %v130_v9 }
  0x16   :  { %71 = vperm.xlu2 %116, %v16_v2  }
  0x1c   :  { %118 = vset.pattern.permute.xlu1 %v131_v10  ;;  %121 = vset.pattern.permute.xlu0 %v132_v11 }
  0x1d   :  { %77 = vperm.xlu1 %118, %v16_v2  }
  0x1e   :  { %119 = vset.pattern.permute.xlu2 %v133_v12 }
  0x1f   :  { %59 = vperm.xlu2 %119, %v16_v2  }
  0x25   :  { %120 = vset.pattern.permute.xlu1 %v132_v11 }
  0x26   :  { %83 = vperm.xlu1 %120, %v16_v2  }
  0x5e   :  { %v43_v13 = vpop.permute.xlu2 %42 }
  0x5f   :  { %v45_v28 = vmul.f32 %v43_v13, %v11_v17 }
  0x67   :  { %v48_v14 = vpop.permute.xlu2 %47 }
  0x68   :  { %v50_v29 = vmul.f32 %v93_v18, %v48_v14 }
  0x6a   :  { %v51_v33 = vadd.f32 %v50_v29, %v45_v28 }
  0x70   :  { %v72_v24 = vpop.permute.xlu2 %71 }
  0x71   :  { %v74_v39 = vmul.f32 %v93_v18, %v72_v24 }
  0x74   :  { %v31_v15 = vpop.permute.xlu1 %30  ;;  %v20_v16 = vpop.permute.xlu0 %19 }
  0x75   :  { %v22_v19 = vmul.f32 %v20_v16, %v11_v17  ;;  %v33_v25 = vmul.f32 %v94_v20, %v31_v15 }
  0x79   :  { %v60_v35 = vpop.permute.xlu2 %59 }
  0x7d   :  { %v37_v21 = vpop.permute.xlu1 %36  ;;  %v25_v22 = vpop.permute.xlu0 %24 }
  0x7e   :  { %v27_v23 = vmul.f32 %v93_v18, %v25_v22 }
  0x80   :  { %v28_v26 = vadd.f32 %v27_v23, %v22_v19 }
  0x82   :  { %v34_v27 = vadd.f32 %v33_v25, %v28_v26 }
  0x84   :  { %v39_v30 = vadd.f32 %v37_v21, %v34_v27 }
  0x86   :  { %v67_v31 = vpop.permute.xlu1 %66  ;;  %v54_v32 = vpop.permute.xlu0 %53  ;;  %40 = vst [vmem:[%s172_s2] sm:$0xff] %v39_v30 }
  0x87   :  { %v56_v34 = vmul.f32 %v94_v20, %v54_v32  ;;  %v69_v40 = vmul.f32 %v67_v31, %v11_v17 }
  0x89   :  { %v57_v36 = vadd.f32 %v56_v34, %v51_v33  ;;  %v75_v42 = vadd.f32 %v74_v39, %v69_v40 }
  0x8b   :  { %v62_v37 = vadd.f32 %v60_v35, %v57_v36 }
  0x8d   :  { %95 = vst [vmem:[%s172_s2 + $0x8] sm:$0xff] %v62_v37 }
  0x8f   :  { %v78_v38 = vpop.permute.xlu1 %77 }
  0x90   :  { %v80_v41 = vmul.f32 %v94_v20, %v78_v38 }
  0x92   :  { %v81_v43 = vadd.f32 %v80_v41, %v75_v42 }
  0x98   :  { %v84_v44 = vpop.permute.xlu1 %83 }
  0x99   :  { %v86_v45 = vadd.f32 %v84_v44, %v81_v43 }
  0x9b   :  { %96 = vst [vmem:[%s172_s2 + $0x10] sm:$0xff] %v86_v45 }

</bundles_post_ra>
